<compile_context>
chip_gen: v7x
topology: tpu7x:2x2x1
jax: 0.10.0
libtpu: 0.0.40
codegen_flags: <defaults>
</compile_context>

<pallas_src>
import functools

import jax
import jax.numpy as jnp
from jax.experimental import pallas as pl
from jax.experimental.pallas import tpu as pltpu


def _pool_out_len(L, kernel_size, stride, padding, dilation, ceil_mode):
    """Output length, identical to PyTorch's MaxPool1d formula."""
    eff = dilation * (kernel_size - 1) + 1
    num = L + 2 * padding - eff
    if ceil_mode:
        out = -(-num // stride) + 1
        # windows that would start entirely in the right padded region are dropped
        if (out - 1) * stride >= L + padding:
            out -= 1
    else:
        out = num // stride + 1
    return out


def minpool1d_kernel(x_ref, o_ref, *, kernel_size, stride, dilation, out_len):
    """x_ref: (Lp, TILE_N) padded input, pooling axis on sublanes, rows on lanes.
    o_ref: (out_len, TILE_N)."""

    def tap(w):
        start = w * dilation
        if stride == 1:
            return x_ref[pl.ds(start, out_len), :]
        # Sublane-strided read: rows start, start+stride, ... (lane stride stays 1).
        return x_ref[pl.ds(start, out_len, stride=stride), :]

    acc = tap(0)
    # Static unrolled tap loop: vmin (VPU slot) co-issues with the next tap's load.
    for w in range(1, kernel_size):
        acc = jnp.minimum(acc, tap(w))
    o_ref[...] = acc


def min_pool1d(x, kernel_size, stride=None, padding=0, dilation=1, ceil_mode=False):
    """MinPool1d forward for x of shape (B, C, L)."""
    if stride is None:
        stride = kernel_size
    B, C, L = x.shape
    N = B * C
    out_len = _pool_out_len(L, kernel_size, stride, padding, dilation, ceil_mode)

    # Min-identity sentinel for padded / out-of-range positions (never wins the min).
    if jnp.issubdtype(x.dtype, jnp.floating):
        fill = float("inf")
    elif jnp.issubdtype(x.dtype, jnp.integer):
        fill = int(jnp.iinfo(x.dtype).max)
    else:
        raise TypeError(f"unsupported dtype for min_pool1d: {x.dtype}")

    # Pad so that every tap read is in-bounds:
    #   max index touched = (out_len-1)*stride + (kernel_size-1)*dilation  (into the
    #   left-padded array).  Round the padded length up to a multiple of 8 sublanes.
    span = (out_len - 1) * stride + (kernel_size - 1) * dilation + 1
    Lp = max(span, L + padding)
    Lp += (-Lp) % 8
    pad_right = Lp - (L + padding)

    # Wrapper-side layout plumbing: flatten (B, C) -> N, pad L, put L on sublanes
    # and N on lanes (lane-dense output, sublane-strided taps).
    x2 = x.reshape(N, L)
    xp = jnp.pad(x2, ((0, 0), (padding, pad_right)), mode="constant",
                 constant_values=fill)
    xp_t = xp.T  # (Lp, N)

    # Lane-axis tile sizing: double-buffered input + output blocks must fit the
    # smallest scoped-VMEM default across generations (v5e: 16 MiB) -> ~12 MiB budget.
    itemsize = x.dtype.itemsize
    vmem_budget = 12 * 1024 * 1024
    per_col = 2 * (Lp + out_len) * itemsize  # bytes per lane column, double-buffered
    cols_fit = max(1, vmem_budget // per_col)
    if N <= 1024 and N <= cols_fit:
        tile_n = N  # single lane block (full dim satisfies the (8,128) rule)
    else:
        tile_n = max(128, (min(cols_fit, 1024, N) // 128) * 128)
    # TODO(synk): for extreme L where even a 128-lane block exceeds the VMEM budget,
    # the length axis would additionally need halo tiling (pl.Element index_map).
    grid_n = pl.cdiv(N, tile_n)

    out_t = pl.pallas_call(
        functools.partial(
            minpool1d_kernel,
            kernel_size=kernel_size,
            stride=stride,
            dilation=dilation,
            out_len=out_len,
        ),
        out_shape=jax.ShapeDtypeStruct((out_len, N), x.dtype),
        grid=(grid_n,),
        in_specs=[pl.BlockSpec((Lp, tile_n), lambda i: (0, i))],
        out_specs=pl.BlockSpec((out_len, tile_n), lambda i: (0, i)),
        compiler_params=pltpu.CompilerParams(dimension_semantics=("parallel",)),
    )(xp_t)

    return out_t.T.reshape(B, C, out_len)


def min_pool1d_ref(x, kernel_size, stride=None, padding=0, dilation=1, ceil_mode=False):
    """Pure-JAX reference mirroring PyTorch's -maxpool1d(-x) (independent code path)."""
    if stride is None:
        stride = kernel_size
    L = x.shape[-1]
    out_len = _pool_out_len(L, kernel_size, stride, padding, dilation, ceil_mode)
    cols = []
    for o in range(out_len):
        vals = []
        for w in range(kernel_size):
            j = o * stride - padding + w * dilation
            if 0 <= j < L:                 # padded / OOB positions are ignored
                vals.append(x[..., j])
        cols.append(jnp.min(jnp.stack(vals, axis=-1), axis=-1))
    return jnp.stack(cols, axis=-1)


if __name__ == "__main__":
    key = jax.random.PRNGKey(0)
    B, C, L = 2, 4, 16
    x = jax.random.normal(key, (B, C, L), jnp.float32)

    configs = [
        dict(kernel_size=3, stride=2, padding=1, dilation=1, ceil_mode=False),
        dict(kernel_size=2, stride=None, padding=0, dilation=2, ceil_mode=False),
        dict(kernel_size=3, stride=2, padding=0, dilation=1, ceil_mode=True),
    ]

    for cfg in configs:
        out = min_pool1d(x, **cfg)
        jax.block_until_ready(out)
        ref = min_pool1d_ref(x, **cfg)
        assert out.shape == ref.shape, (out.shape, ref.shape, cfg)
        assert jnp.allclose(out, ref, atol=1e-6, rtol=1e-6), cfg

    print("KERNEL_OK")
</pallas_src>

<mosaic_0001>
module attributes {stable_mosaic.version = 11 : i64} {
  func.func @minpool1d_kernel(%arg0: i32, %arg1: memref<24x8xf32, #tpu.memory_space<vmem>>, %arg2: memref<8x8xf32, #tpu.memory_space<vmem>>) attributes {dimension_semantics = [#tpu.dimension_semantics<parallel>], iteration_bounds = array<i64: 1>, scalar_prefetch = 0 : i64, scratch_operands = 0 : i64, tpu.core_type = #tpu.core_type<tc>, window_params = [{transform_indices = @transform_0, window_bounds = array<i64: 24, 8>}, {transform_indices = @transform_1, window_bounds = array<i64: 8, 8>}]} {
    %c0 = arith.constant 0 : index
    %c0_0 = arith.constant 0 : index
    %0 = tpu.strided_load %arg1[%c0, %c0_0] {strides = array<i32: 2, 1>} : memref<24x8xf32, #tpu.memory_space<vmem>>, vector<8x8xf32>
    %c1 = arith.constant 1 : index
    %c0_1 = arith.constant 0 : index
    %1 = tpu.strided_load %arg1[%c1, %c0_1] {strides = array<i32: 2, 1>} : memref<24x8xf32, #tpu.memory_space<vmem>>, vector<8x8xf32>
    %2 = arith.minimumf %0, %1 : vector<8x8xf32>
    %c2 = arith.constant 2 : index
    %c0_2 = arith.constant 0 : index
    %3 = tpu.strided_load %arg1[%c2, %c0_2] {strides = array<i32: 2, 1>} : memref<24x8xf32, #tpu.memory_space<vmem>>, vector<8x8xf32>
    %4 = arith.minimumf %2, %3 : vector<8x8xf32>
    %c0_3 = arith.constant 0 : index
    %c0_4 = arith.constant 0 : index
    %5 = vector.load %arg2[%c0_3, %c0_4] : memref<8x8xf32, #tpu.memory_space<vmem>>, vector<8x8xf32>
    tpu.vector_store %arg2[%c0_3, %c0_4], %4 {strides = array<i32>} : memref<8x8xf32, #tpu.memory_space<vmem>>, vector<8x8xf32>,
    return
  }
  func.func @transform_0(%arg0: i32) -> (i32, i32) {
    %c0_i32 = arith.constant 0 : i32
    %c0_i32_0 = arith.constant 0 : i32
    return %c0_i32, %arg0 : i32, i32
  }
  func.func @transform_1(%arg0: i32) -> (i32, i32) {
    %c0_i32 = arith.constant 0 : i32
    %c0_i32_0 = arith.constant 0 : i32
    return %c0_i32, %arg0 : i32, i32
  }
}

</mosaic_0001>

<bundles_post_ra>
// kernel: tpu_custom_call.1
= control target key start
LH: loop header
LB: loop body
LE: loop exit
PB: predicated region body
PF: predicated region fallthrough
CT: control target
= control target key end

     0   :  { %s91_s0 = inlined_call_operand.vmem [shape: f32[24,8], index: 0, kind: input, shape index: {}]   ;;  %s92_s1 = inlined_call_operand.hbm [shape: f32[8,8], index: 1, kind: output, shape index: {}]  }
   0x1   :  { %v9_v0 = vld [vmem:[%s91_s0] ss:$2 sm:$0xff]  ;;  %v32_v1 = vld [vmem:[%s91_s0 + $0x1] ss:$2 sm:$0xff] }
   0x2   :  { %v33_v2 = vld [vmem:[%s91_s0 + $0x2] ss:$2 sm:$0xff]  ;;  %v12_v3 = vmin.f32 %v9_v0, %v32_v1 }
   0x3   :  { %6 = vsyncpa [#allocation3], 0  ;;  %vm16_vm0 = vcmask 64512   ;;  %s59_s12 = smov [#allocation2]  }
   0x4   :  { %s24_s13 = sshll.u32 %s59_s12, 4  ;;  %v15_v4 = vmin.f32 %v12_v3, %v33_v2  ;;  %s25_s13 = int_to_ptr.vmem [resolvable:$true] %s24_s13 }
   0x5   :  { %s35_s14 = scalar_lea.vmem %s25_s13, 128  ;;  %p40_p1 = scmp.lt.s32.totalorder %s25_s13, %s25_s13 }
   0x6   :  { %17 = vst.msk [vmem:[#allocation2] sm:$0xff] %vm16_vm0, %v15_v4  ;;  %p36_p0 = scmp.ne.s32.totalorder %s25_s13, %s35_s14  ;;  %p41_p2 = scmp.lt.s32.totalorder %s35_s14, %s35_s14 }
   0x8   :  { %p42_p3 = por %p41_p2, %p40_p1 }
   0xa   :  { %p43_p4 = pnand %p42_p3, %p36_p0 }
   0xc   :  { %46 = shalt.err (!%p43_p4)
}
   0xd   :  { %s47_s17 = scalar_lea.hbm %s92_s1, 128 }
   0xe   :  { %p48_p5 = scmp.ne.s32.totalorder %s92_s1, %s47_s17  ;;  %p51_p6 = scmp.lt.u32.totalorder %s47_s17, %s92_s1 }
  0x10   :  { %p53_p7 = pnand %p51_p6, %p48_p5 }
  0x12   :  { %56 = shalt.err (!%p53_p7)
}
  0x13   :  { %27 = dma.vmem_to_hbm [thread:$0]  %s25_s13, 128, %s92_s1, [#allocation3]  }
  0x14   :  { %57 = dma.done.wait [#allocation3], 128  }
  0x15   :  { %58 = vsyncadd [#allocation3], 4294967168 }
  0x16   :  { %31 = vsyncpa [#allocation3], 1 }

</bundles_post_ra>
